<compile_context>
chip_gen: v7x
topology: tpu7x:2x2x1
jax: 0.10.0
libtpu: 0.0.40
codegen_flags: <defaults>
</compile_context>

<pallas_src>
import functools

import jax
import jax.numpy as jnp
from jax import lax
from jax.experimental import pallas as pl
from jax.experimental.pallas import tpu as pltpu


def _round_up(x, m):
    return (x + m - 1) // m * m


def fused_mbconv_kernel(xwin_ref, w1_ref, b1_ref, wfc1_ref, bfc1_ref,
                        wfc2_ref, bfc2_ref, w2_ref, b2_ref, out_ref,
                        stk_ref, pool_ref, *, W, HW, TILE_HW):
    """Grid = (batch, phase, hw_tile); channels on sublanes, HW tile on lanes.

    xwin_ref : (1, 1, Cin, WIN)   f32  per-tile input window (3x3 halo included)
    w1_ref   : (hidden, 9*Cin)    bf16 3x3 conv weights, BN folded (dx,dy,ch-major)
    b1_ref   : (hidden, 1)        f32  folded BN bias of conv1
    wfc1_ref : (hidden, se_h)     f32  SE fc1 weight (transposed)
    bfc1_ref : (1, se_h)          f32
    wfc2_ref : (hidden, se_h)     f32  SE fc2 weight
    bfc2_ref : (hidden, 1)        f32
    w2_ref   : (Cout, hidden)     bf16 1x1 conv weights, BN folded
    b2_ref   : (Cout, 1)          f32  folded BN bias of conv2
    out_ref  : (1, Cout, TILE_HW) f32  lane-dense output tile
    stk_ref  : (9*Cin, TILE_HW)   f32  scratch: stacked conv1 taps
    pool_ref : (hidden, 1)        f32  scratch: SE pooling accumulator
    """
    p = pl.program_id(1)
    t = pl.program_id(2)
    cin = xwin_ref.shape[2]

    win = xwin_ref[0, 0]                                   # (Cin, WIN) f32

    # Column masks emulate the W-direction zero padding for the dx = +-1 taps
    # (the dy shifts read real zero-padded rows inside the window).
    col = lax.broadcasted_iota(jnp.int32, (1, TILE_HW), 1) % W
    keep_l = col != 0
    keep_r = col != (W - 1)

    # conv1 taps: nine register shifts of the window, written into a single
    # stacked (9*Cin, TILE_HW) operand (dx-major, then dy, then channel) so
    # conv1 is ONE K = 9*Cin MXU contraction instead of nine K = Cin matmuls
    # (avoids 9x MXU push/pop and eight full-width f32 accumulate adds).
    x_tile = None
    for g, dx in enumerate((-1, 0, 1)):
        for r, dy in enumerate((-1, 0, 1)):
            off = (dy + 2) * W + dx
            tap = win[:, off:off + TILE_HW]                # (Cin, TILE_HW)
            if dx == -1:
                tap = jnp.where(keep_l, tap, 0.0)
            elif dx == 1:
                tap = jnp.where(keep_r, tap, 0.0)
            elif dy == 0:
                x_tile = tap                               # residual (== x tile)
            row0 = (g * 3 + r) * cin
            stk_ref[row0:row0 + cin, :] = tap

    stacked = stk_ref[...].astype(jnp.bfloat16)            # single bulk bf16 cast

    # conv1 (+ folded BN bias) + ReLU: one bf16 MXU matmul, f32 accumulation.
    acc = jnp.dot(w1_ref[...], stacked, preferred_element_type=jnp.float32)
    h = jnp.maximum(acc + b1_ref[...], 0.0)                # (hidden, TILE_HW)

    # ---- phase 0: accumulate the SE global-average-pool sums over all tiles.
    @pl.when((p == 0) & (t == 0))
    def _zero_pool():
        pool_ref[...] = jnp.zeros_like(pool_ref)

    @pl.when(p == 0)
    def _accumulate_pool():
        pool_ref[...] = pool_ref[...] + jnp.sum(h, axis=1, keepdims=True)

    # ---- phase 1: SE gate (full-image mean), 1x1 conv, residual, final ReLU.
    # conv1 is recomputed per tile rather than round-tripping the (hidden, HW)
    # activation through HBM; with hidden = 4*Cin that is the cheaper option.
    @pl.when(p == 1)
    def _emit():
        pooled = pool_ref[...] * (1.0 / float(HW))         # (hidden, 1)
        # Tiny SE FCs on the VPU/XLU: no MXU push/pop for 1-wide operands.
        s = jnp.sum(wfc1_ref[...] * pooled, axis=0, keepdims=True)
        s = jnp.maximum(s + bfc1_ref[...], 0.0)            # (1, se_h)
        z = jnp.sum(wfc2_ref[...] * s, axis=1, keepdims=True) + bfc2_ref[...]
        gate = 1.0 / (1.0 + jnp.exp(-z))                   # (hidden, 1)

        hg = (h * gate).astype(jnp.bfloat16)
        y = jnp.dot(w2_ref[...], hg, preferred_element_type=jnp.float32)
        y = y + b2_ref[...] + x_tile                       # BN bias + identity
        out_ref[0] = jnp.maximum(y, 0.0)


def _choose_tile_rows(H, W, cin, hidden, cout, budget_bytes=6 << 20):
    """Whole-row HW tile: rows | H, rows*W % 128 == 0, footprint under budget,
    preferring >= 2 tiles per image so the pipeline has depth."""
    cands = [r for r in range(1, H + 1) if H % r == 0 and (r * W) % 128 == 0]
    assert cands, "need a whole-row HW tile with rows*W % 128 == 0"
    bytes_per_lane = 4 * (10 * cin + 3 * hidden + 2 * cout) + 2 * 9 * cin
    fitting = [r for r in cands if r * W * bytes_per_lane <= budget_bytes]
    rows = max(fitting) if fitting else min(cands)
    if H // rows < 2:
        smaller = [c for c in cands if H // c >= 2]
        if smaller:
            rows = max(smaller)
    return rows


def fused_mbconv(x_nchw, params):
    """x_nchw: (N, Cin, H, W) float32 -> (N, Cout, H, W) float32."""
    w1, b1, wfc1, bfc1, wfc2, bfc2, w2, b2 = params
    N, Cin, H, W = x_nchw.shape
    HW = H * W
    hidden = w1.shape[0]
    Cout = w2.shape[0]
    assert w1.shape[1] == 9 * Cin
    assert Cout == Cin, "identity residual path requires in_ch == out_ch"

    tile_rows = _choose_tile_rows(H, W, Cin, hidden, Cout)
    tile_hw = tile_rows * W
    n_tiles = H // tile_rows
    halo = _round_up(3 * W + 1, 128)          # lane-aligned window slack
    win = tile_hw + halo

    # Zero-pad two rows top/bottom (every tap becomes a non-negative static
    # offset), then build per-tile overlapping windows so the kernel needs no
    # dynamic / unaligned indexing.  Duplication is only halo/tile (not 9x
    # im2col) and the windows are DMA'd and double-buffered per grid step.
    x_flat = jnp.pad(x_nchw, ((0, 0), (0, 0), (2, 2), (0, 0)))
    x_flat = x_flat.reshape(N, Cin, (H + 4) * W)
    need = (n_tiles - 1) * tile_hw + win
    if need > x_flat.shape[-1]:
        x_flat = jnp.pad(x_flat, ((0, 0), (0, 0), (0, need - x_flat.shape[-1])))
    x_win = jnp.stack(
        [x_flat[:, :, i * tile_hw:i * tile_hw + win] for i in range(n_tiles)],
        axis=1)                                            # (N, T, Cin, win)

    def _rep(a):
        return pl.BlockSpec(a.shape, lambda n, p, t, nd=a.ndim: (0,) * nd)

    # Explicit VMEM limit (v5e scoped default is only 16 MiB); estimate the
    # per-step footprint (double-buffered blocks + scratch + temporaries).
    est = (2 * Cin * win + 2 * Cout * tile_hw
           + 9 * Cin * tile_hw + 6 * hidden * tile_hw) * 4 + (2 << 20)
    vmem_limit = int(min(48 << 20, max(32 << 20, 2 * est)))

    kernel = functools.partial(fused_mbconv_kernel, W=W, HW=HW, TILE_HW=tile_hw)
    out = pl.pallas_call(
        kernel,
        out_shape=jax.ShapeDtypeStruct((N, Cout, HW), jnp.float32),
        grid_spec=pltpu.PrefetchScalarGridSpec(
            num_scalar_prefetch=0,
            grid=(N, 2, n_tiles),              # (batch, SE phase, HW tile)
            in_specs=[
                pl.BlockSpec((1, 1, Cin, win), lambda n, p, t: (n, t, 0, 0)),
                _rep(w1), _rep(b1),
                _rep(wfc1), _rep(bfc1),
                _rep(wfc2), _rep(bfc2),
                _rep(w2), _rep(b2),
            ],
            # Output block is only produced in phase 1; during phase 0 all
            # steps alias tile 0's block so no spurious write-backs occur and
            # every output block has a single contiguous visit.
            out_specs=pl.BlockSpec((1, Cout, tile_hw),
                                   lambda n, p, t: (n, 0, p * t)),
            scratch_shapes=[
                pltpu.VMEM((9 * Cin, tile_hw), jnp.float32),   # stacked taps
                pltpu.VMEM((hidden, 1), jnp.float32),          # SE pool accum
            ],
        ),
        compiler_params=pltpu.CompilerParams(
            dimension_semantics=("parallel", "arbitrary", "arbitrary"),
            vmem_limit_bytes=vmem_limit),
    )(x_win, w1, b1, wfc1, bfc1, wfc2, bfc2, w2, b2)
    return out.reshape(N, Cout, H, W)


def make_params(key, in_ch=4, out_ch=4, expansion=4.0, se_reduction=4.0):
    hidden = int(round(in_ch * expansion))
    se_hidden = int(round(hidden * (1.0 / se_reduction)))
    eps = 1e-5
    ks = jax.random.split(key, 14)

    def bn_fold(kg, kb, km, kv, ch):
        gamma = jax.random.normal(kg, (ch,)) * 0.1 + 1.0
        beta = jax.random.normal(kb, (ch,)) * 0.1
        mean = jax.random.normal(km, (ch,)) * 0.1
        var = jax.random.uniform(kv, (ch,), minval=0.5, maxval=1.5)
        scale = gamma / jnp.sqrt(var + eps)
        bias = beta - mean * scale
        return scale, bias

    # conv1: PyTorch OIHW weight, eval-mode BN scale folded in.  Kernel layout
    # is (hidden, 9*Cin) with k = (dx+1)*3*Cin + (dy+1)*Cin + c (dx-major).
    w1_oihw = jax.random.normal(ks[0], (hidden, in_ch, 3, 3)) * 0.1
    s1, b1 = bn_fold(ks[1], ks[2], ks[3], ks[4], hidden)
    w1_folded = w1_oihw * s1[:, None, None, None]          # (o, i, kh, kw)
    w1_k = jnp.transpose(w1_folded, (0, 3, 2, 1)).reshape(hidden, 9 * in_ch)
    w1_k = w1_k.astype(jnp.bfloat16)                       # MXU operand

    # SE block (SEModule.norm1 is unused in forward); fc1 weight is stored
    # transposed so both SE FCs are (hidden, se_hidden) VPU-friendly slabs.
    wfc1 = jax.random.normal(ks[5], (se_hidden, hidden)) * 0.1   # torch layout
    bfc1 = jax.random.normal(ks[6], (se_hidden,)) * 0.1
    wfc2 = jax.random.normal(ks[7], (hidden, se_hidden)) * 0.1   # torch layout
    bfc2 = jax.random.normal(ks[8], (hidden,)) * 0.1

    # conv2: 1x1 (out_ch, hidden); BN scale folded; bf16 MXU operand.
    w2 = jax.random.normal(ks[9], (out_ch, hidden)) * 0.1
    s2, b2 = bn_fold(ks[10], ks[11], ks[12], ks[13], out_ch)
    w2_k = (w2 * s2[:, None]).astype(jnp.bfloat16)

    f32 = jnp.float32
    return (w1_k,
            b1.reshape(hidden, 1).astype(f32),
            wfc1.T.astype(f32),                            # (hidden, se_hidden)
            bfc1.reshape(1, se_hidden).astype(f32),
            wfc2.astype(f32),                              # (hidden, se_hidden)
            bfc2.reshape(hidden, 1).astype(f32),
            w2_k,
            b2.reshape(out_ch, 1).astype(f32))


def reference(x_nchw, params):
    """Pure-JAX reference (eval-mode BN folded), mirroring the kernel's bf16
    quantization of the conv1 and conv2 MXU operands."""
    w1, b1, wfc1_t, bfc1, wfc2, bfc2, w2, b2 = params
    hidden = w1.shape[0]
    cin = w1.shape[1] // 9
    # Reassemble OIHW conv1 weights from the kernel's (o, dx, dy, i) layout.
    w1_oihw = jnp.transpose(
        w1.astype(jnp.float32).reshape(hidden, 3, 3, cin), (0, 3, 2, 1))
    xq = x_nchw.astype(jnp.bfloat16).astype(jnp.float32)
    h = lax.conv_general_dilated(
        xq, w1_oihw, window_strides=(1, 1), padding="SAME",
        dimension_numbers=("NCHW", "OIHW", "NCHW"))
    h = jnp.maximum(h + b1.reshape(1, hidden, 1, 1), 0.0)
    pooled = jnp.mean(h, axis=(2, 3))                              # (N, hidden)
    s = jnp.maximum(pooled @ wfc1_t + bfc1, 0.0)                   # (N, se_h)
    z = s @ wfc2.T + bfc2.reshape(1, -1)                           # (N, hidden)
    gate = 1.0 / (1.0 + jnp.exp(-z))
    hg = h * gate[:, :, None, None]
    hgq = hg.astype(jnp.bfloat16).astype(jnp.float32)              # conv2 bf16 operand
    y = jnp.einsum("oc,nchw->nohw", w2.astype(jnp.float32), hgq)
    y = y + b2.reshape(1, -1, 1, 1)
    return jnp.maximum(y + x_nchw, 0.0)


if __name__ == "__main__":
    key = jax.random.PRNGKey(0)
    kx, kp = jax.random.split(key)
    N, C, H, W = 2, 4, 16, 16
    x = jax.random.normal(kx, (N, C, H, W), dtype=jnp.float32)   # NCHW

    params = make_params(kp, in_ch=C, out_ch=C)

    out = jax.jit(fused_mbconv)(x, params)
    out = jax.block_until_ready(out)

    ref = reference(x, params)
    assert out.shape == (N, C, H, W)
    err = float(jnp.max(jnp.abs(out - ref)))
    # Tolerance covers f32 summation-order differences plus the (mirrored)
    # bf16 quantization of the conv1 / conv2 MXU operands.
    assert jnp.allclose(out, ref, rtol=2e-3, atol=2e-3), (
        f"mismatch vs JAX reference (max abs err={err})")
    print("KERNEL_OK")
</pallas_src>

<mosaic_0001>
module attributes {stable_mosaic.version = 11 : i64} {
  func.func @fused_mbconv_kernel(%arg0: i32, %arg1: i32, %arg2: i32, %arg3: memref<1x1x4x256xf32, #tpu.memory_space<vmem>>, %arg4: memref<16x36xbf16, #tpu.memory_space<vmem>>, %arg5: memref<16x1xf32, #tpu.memory_space<vmem>>, %arg6: memref<16x4xf32, #tpu.memory_space<vmem>>, %arg7: memref<1x4xf32, #tpu.memory_space<vmem>>, %arg8: memref<16x4xf32, #tpu.memory_space<vmem>>, %arg9: memref<16x1xf32, #tpu.memory_space<vmem>>, %arg10: memref<4x16xbf16, #tpu.memory_space<vmem>>, %arg11: memref<4x1xf32, #tpu.memory_space<vmem>>, %arg12: memref<1x4x128xf32, #tpu.memory_space<vmem>>, %arg13: memref<36x128xf32, #tpu.memory_space<vmem>>, %arg14: memref<16x1xf32, #tpu.memory_space<vmem>>) attributes {dimension_semantics = [#tpu.dimension_semantics<parallel>, #tpu.dimension_semantics<arbitrary>, #tpu.dimension_semantics<arbitrary>], iteration_bounds = array<i64: 2, 2, 2>, scalar_prefetch = 0 : i64, scratch_operands = 2 : i64, tpu.core_type = #tpu.core_type<tc>, window_params = [{transform_indices = @transform_0, window_bounds = array<i64: 1, 1, 4, 256>}, {pipeline_mode = #tpu.pipeline_mode<synchronous>, transform_indices = @transform_1, window_bounds = array<i64: 16, 36>}, {pipeline_mode = #tpu.pipeline_mode<synchronous>, transform_indices = @transform_2, window_bounds = array<i64: 16, 1>}, {pipeline_mode = #tpu.pipeline_mode<synchronous>, transform_indices = @transform_3, window_bounds = array<i64: 16, 4>}, {pipeline_mode = #tpu.pipeline_mode<synchronous>, transform_indices = @transform_4, window_bounds = array<i64: 1, 4>}, {pipeline_mode = #tpu.pipeline_mode<synchronous>, transform_indices = @transform_5, window_bounds = array<i64: 16, 4>}, {pipeline_mode = #tpu.pipeline_mode<synchronous>, transform_indices = @transform_6, window_bounds = array<i64: 16, 1>}, {pipeline_mode = #tpu.pipeline_mode<synchronous>, transform_indices = @transform_7, window_bounds = array<i64: 4, 16>}, {pipeline_mode = #tpu.pipeline_mode<synchronous>, transform_indices = @transform_8, window_bounds = array<i64: 4, 1>}, {transform_indices = @transform_9, window_bounds = array<i64: 1, 4, 128>}]} {
    %c0 = arith.constant 0 : index
    %c0_0 = arith.constant 0 : index
    %c0_1 = arith.constant 0 : index
    %c0_2 = arith.constant 0 : index
    %0 = vector.load %arg3[%c0, %c0_0, %c0_1, %c0_2] : memref<1x1x4x256xf32, #tpu.memory_space<vmem>>, vector<1x1x4x256xf32>
    %1 = vector.shape_cast %0 : vector<1x1x4x256xf32> to vector<4x256xf32>
    %2 = tpu.iota {dimensions = array<i32: 1>} : vector<1x128xi32>
    %c16_i32 = arith.constant 16 : i32
    %c0_i32 = arith.constant 0 : i32
    %3 = arith.cmpi eq, %c16_i32, %c0_i32 : i32
    %c1_i32 = arith.constant 1 : i32
    %4 = arith.select %3, %c1_i32, %c16_i32 : i32
    %5 = vector.broadcast %4 : i32 to vector<1x128xi32>
    %6 = arith.remsi %2, %5 : vector<1x128xi32>
    %c0_i32_3 = arith.constant 0 : i32
    %7 = vector.broadcast %c0_i32_3 : i32 to vector<1x128xi32>
    %8 = arith.cmpi ne, %6, %7 : vector<1x128xi32>
    %c0_i32_4 = arith.constant 0 : i32
    %9 = vector.broadcast %c0_i32_4 : i32 to vector<1x128xi32>
    %10 = arith.cmpi slt, %6, %9 : vector<1x128xi32>
    %c0_i32_5 = arith.constant 0 : i32
    %11 = arith.cmpi slt, %4, %c0_i32_5 : i32
    %12 = vector.broadcast %11 : i1 to vector<1x128xi1>
    %13 = vector.broadcast %12 : vector<1x128xi1> to vector<1x128xi1>
    %14 = arith.xori %10, %13 : vector<1x128xi1>
    %15 = arith.andi %14, %8 : vector<1x128xi1>
    %16 = vector.broadcast %4 : i32 to vector<1x128xi32>
    %17 = arith.addi %6, %16 : vector<1x128xi32>
    %18 = arith.select %15, %17, %6 : vector<1x128xi1>, vector<1x128xi32>
    %c0_i32_6 = arith.constant 0 : i32
    %19 = vector.broadcast %c0_i32_6 : i32 to vector<1x128xi32>
    %20 = arith.cmpi ne, %18, %19 : vector<1x128xi32>
    %c15_i32 = arith.constant 15 : i32
    %21 = vector.broadcast %c15_i32 : i32 to vector<1x128xi32>
    %22 = arith.cmpi ne, %18, %21 : vector<1x128xi32>
    %23 = vector.extract_strided_slice %1 {offsets = [0, 15], sizes = [4, 128], strides = [1, 1]} : vector<4x256xf32> to vector<4x128xf32>
    %cst = arith.constant 0.000000e+00 : f32
    %24 = vector.shape_cast %20 : vector<1x128xi1> to vector<1x128xi1>
    %25 = vector.broadcast %24 : vector<1x128xi1> to vector<4x128xi1>
    %26 = vector.broadcast %cst : f32 to vector<4x128xf32>
    %27 = arith.select %25, %23, %26 : vector<4x128xi1>, vector<4x128xf32>
    %c0_7 = arith.constant 0 : index
    %c0_8 = arith.constant 0 : index
    %28 = vector.load %arg13[%c0_7, %c0_8] : memref<36x128xf32, #tpu.memory_space<vmem>>, vector<4x128xf32>
    tpu.vector_store %arg13[%c0_7, %c0_8], %27 {strides = array<i32>} : memref<36x128xf32, #tpu.memory_space<vmem>>, vector<4x128xf32>,
    %29 = vector.extract_strided_slice %1 {offsets = [0, 31], sizes = [4, 128], strides = [1, 1]} : vector<4x256xf32> to vector<4x128xf32>
    %cst_9 = arith.constant 0.000000e+00 : f32
    %30 = vector.shape_cast %20 : vector<1x128xi1> to vector<1x128xi1>
    %31 = vector.broadcast %30 : vector<1x128xi1> to vector<4x128xi1>
    %32 = vector.broadcast %cst_9 : f32 to vector<4x128xf32>
    %33 = arith.select %31, %29, %32 : vector<4x128xi1>, vector<4x128xf32>
    %c4 = arith.constant 4 : index
    %c0_10 = arith.constant 0 : index
    %34 = vector.load %arg13[%c4, %c0_10] : memref<36x128xf32, #tpu.memory_space<vmem>>, vector<4x128xf32>
    tpu.vector_store %arg13[%c4, %c0_10], %33 {strides = array<i32>} : memref<36x128xf32, #tpu.memory_space<vmem>>, vector<4x128xf32>,
    %35 = vector.extract_strided_slice %1 {offsets = [0, 47], sizes = [4, 128], strides = [1, 1]} : vector<4x256xf32> to vector<4x128xf32>
    %cst_11 = arith.constant 0.000000e+00 : f32
    %36 = vector.shape_cast %20 : vector<1x128xi1> to vector<1x128xi1>
    %37 = vector.broadcast %36 : vector<1x128xi1> to vector<4x128xi1>
    %38 = vector.broadcast %cst_11 : f32 to vector<4x128xf32>
    %39 = arith.select %37, %35, %38 : vector<4x128xi1>, vector<4x128xf32>
    %c8 = arith.constant 8 : index
    %c0_12 = arith.constant 0 : index
    %40 = vector.load %arg13[%c8, %c0_12] : memref<36x128xf32, #tpu.memory_space<vmem>>, vector<4x128xf32>
    tpu.vector_store %arg13[%c8, %c0_12], %39 {strides = array<i32>} : memref<36x128xf32, #tpu.memory_space<vmem>>, vector<4x128xf32>,
    %41 = vector.extract_strided_slice %1 {offsets = [0, 16], sizes = [4, 128], strides = [1, 1]} : vector<4x256xf32> to vector<4x128xf32>
    %c12 = arith.constant 12 : index
    %c0_13 = arith.constant 0 : index
    %42 = vector.load %arg13[%c12, %c0_13] : memref<36x128xf32, #tpu.memory_space<vmem>>, vector<4x128xf32>
    tpu.vector_store %arg13[%c12, %c0_13], %41 {strides = array<i32>} : memref<36x128xf32, #tpu.memory_space<vmem>>, vector<4x128xf32>,
    %43 = vector.extract_strided_slice %1 {offsets = [0, 32], sizes = [4, 128], strides = [1, 1]} : vector<4x256xf32> to vector<4x128xf32>
    %c16 = arith.constant 16 : index
    %c0_14 = arith.constant 0 : index
    %44 = vector.load %arg13[%c16, %c0_14] : memref<36x128xf32, #tpu.memory_space<vmem>>, vector<4x128xf32>
    tpu.vector_store %arg13[%c16, %c0_14], %43 {strides = array<i32>} : memref<36x128xf32, #tpu.memory_space<vmem>>, vector<4x128xf32>,
    %45 = vector.extract_strided_slice %1 {offsets = [0, 48], sizes = [4, 128], strides = [1, 1]} : vector<4x256xf32> to vector<4x128xf32>
    %c20 = arith.constant 20 : index
    %c0_15 = arith.constant 0 : index
    %46 = vector.load %arg13[%c20, %c0_15] : memref<36x128xf32, #tpu.memory_space<vmem>>, vector<4x128xf32>
    tpu.vector_store %arg13[%c20, %c0_15], %45 {strides = array<i32>} : memref<36x128xf32, #tpu.memory_space<vmem>>, vector<4x128xf32>,
    %47 = vector.extract_strided_slice %1 {offsets = [0, 17], sizes = [4, 128], strides = [1, 1]} : vector<4x256xf32> to vector<4x128xf32>
    %cst_16 = arith.constant 0.000000e+00 : f32
    %48 = vector.shape_cast %22 : vector<1x128xi1> to vector<1x128xi1>
    %49 = vector.broadcast %48 : vector<1x128xi1> to vector<4x128xi1>
    %50 = vector.broadcast %cst_16 : f32 to vector<4x128xf32>
    %51 = arith.select %49, %47, %50 : vector<4x128xi1>, vector<4x128xf32>
    %c24 = arith.constant 24 : index
    %c0_17 = arith.constant 0 : index
    %52 = vector.load %arg13[%c24, %c0_17] : memref<36x128xf32, #tpu.memory_space<vmem>>, vector<4x128xf32>
    tpu.vector_store %arg13[%c24, %c0_17], %51 {strides = array<i32>} : memref<36x128xf32, #tpu.memory_space<vmem>>, vector<4x128xf32>,
    %53 = vector.extract_strided_slice %1 {offsets = [0, 33], sizes = [4, 128], strides = [1, 1]} : vector<4x256xf32> to vector<4x128xf32>
    %cst_18 = arith.constant 0.000000e+00 : f32
    %54 = vector.shape_cast %22 : vector<1x128xi1> to vector<1x128xi1>
    %55 = vector.broadcast %54 : vector<1x128xi1> to vector<4x128xi1>
    %56 = vector.broadcast %cst_18 : f32 to vector<4x128xf32>
    %57 = arith.select %55, %53, %56 : vector<4x128xi1>, vector<4x128xf32>
    %c28 = arith.constant 28 : index
    %c0_19 = arith.constant 0 : index
    %58 = vector.load %arg13[%c28, %c0_19] : memref<36x128xf32, #tpu.memory_space<vmem>>, vector<4x128xf32>
    tpu.vector_store %arg13[%c28, %c0_19], %57 {strides = array<i32>} : memref<36x128xf32, #tpu.memory_space<vmem>>, vector<4x128xf32>,
    %59 = vector.extract_strided_slice %1 {offsets = [0, 49], sizes = [4, 128], strides = [1, 1]} : vector<4x256xf32> to vector<4x128xf32>
    %cst_20 = arith.constant 0.000000e+00 : f32
    %60 = vector.shape_cast %22 : vector<1x128xi1> to vector<1x128xi1>
    %61 = vector.broadcast %60 : vector<1x128xi1> to vector<4x128xi1>
    %62 = vector.broadcast %cst_20 : f32 to vector<4x128xf32>
    %63 = arith.select %61, %59, %62 : vector<4x128xi1>, vector<4x128xf32>
    %c32 = arith.constant 32 : index
    %c0_21 = arith.constant 0 : index
    %64 = vector.load %arg13[%c32, %c0_21] : memref<36x128xf32, #tpu.memory_space<vmem>>, vector<4x128xf32>
    tpu.vector_store %arg13[%c32, %c0_21], %63 {strides = array<i32>} : memref<36x128xf32, #tpu.memory_space<vmem>>, vector<4x128xf32>,
    %c0_22 = arith.constant 0 : index
    %c0_23 = arith.constant 0 : index
    %65 = vector.load %arg13[%c0_22, %c0_23] : memref<36x128xf32, #tpu.memory_space<vmem>>, vector<36x128xf32>
    %66 = arith.truncf %65 : vector<36x128xf32> to vector<36x128xbf16>
    %c0_24 = arith.constant 0 : index
    %c0_25 = arith.constant 0 : index
    %67 = vector.load %arg4[%c0_24, %c0_25] : memref<16x36xbf16, #tpu.memory_space<vmem>>, vector<16x36xbf16>
    %cst_26 = arith.constant dense<0.000000e+00> : vector<16x128xf32>
    %68 = tpu.matmul %67, %66, %cst_26 {dimension_numbers = #tpu.dot_dimension_numbers<[1], [0], [0], [1], [0, 0, 1, 1], [], []>} : vector<16x36xbf16>, vector<36x128xbf16>, vector<16x128xf32> -> vector<16x128xf32>
    %c0_27 = arith.constant 0 : index
    %c0_28 = arith.constant 0 : index
    %69 = vector.load %arg5[%c0_27, %c0_28] : memref<16x1xf32, #tpu.memory_space<vmem>>, vector<16x1xf32>
    %70 = vector.broadcast %69 : vector<16x1xf32> to vector<16x128xf32>
    %71 = arith.addf %68, %70 : vector<16x128xf32>
    %cst_29 = arith.constant 0.000000e+00 : f32
    %72 = vector.broadcast %cst_29 : f32 to vector<16x128xf32>
    %73 = arith.maximumf %71, %72 : vector<16x128xf32>
    %c0_i32_30 = arith.constant 0 : i32
    %74 = arith.cmpi eq, %arg1, %c0_i32_30 : i32
    %c0_i32_31 = arith.constant 0 : i32
    %75 = arith.cmpi eq, %arg2, %c0_i32_31 : i32
    %76 = arith.andi %74, %75 : i1
    %77 = arith.extui %76 : i1 to i32
    %c0_i32_32 = arith.constant 0 : i32
    %78 = arith.cmpi ne, %77, %c0_i32_32 : i32
    scf.if %78 {
      %cst_37 = arith.constant 0.000000e+00 : f32
      %85 = vector.broadcast %cst_37 : f32 to vector<16x1xf32>
      %c0_38 = arith.constant 0 : index
      %c0_39 = arith.constant 0 : index
      %86 = vector.load %arg14[%c0_38, %c0_39] : memref<16x1xf32, #tpu.memory_space<vmem>>, vector<16x1xf32>
      tpu.vector_store %arg14[%c0_38, %c0_39], %85 {strides = array<i32>} : memref<16x1xf32, #tpu.memory_space<vmem>>, vector<16x1xf32>,
    } else {
    }
    %c0_i32_33 = arith.constant 0 : i32
    %79 = arith.cmpi eq, %arg1, %c0_i32_33 : i32
    %80 = arith.extui %79 : i1 to i32
    %c0_i32_34 = arith.constant 0 : i32
    %81 = arith.cmpi ne, %80, %c0_i32_34 : i32
    scf.if %81 {
      %c0_37 = arith.constant 0 : index
      %c0_38 = arith.constant 0 : index
      %85 = vector.load %arg14[%c0_37, %c0_38] : memref<16x1xf32, #tpu.memory_space<vmem>>, vector<16x1xf32>
      %cst_39 = arith.constant dense<0.000000e+00> : vector<16xf32>
      %86 = vector.multi_reduction <add>, %73, %cst_39 [1] : vector<16x128xf32> to vector<16xf32>
      %87 = vector.shape_cast %86 : vector<16xf32> to vector<16x1xf32>
      %88 = arith.addf %85, %87 : vector<16x1xf32>
      %c0_40 = arith.constant 0 : index
      %c0_41 = arith.constant 0 : index
      %89 = vector.load %arg14[%c0_40, %c0_41] : memref<16x1xf32, #tpu.memory_space<vmem>>, vector<16x1xf32>
      tpu.vector_store %arg14[%c0_40, %c0_41], %88 {strides = array<i32>} : memref<16x1xf32, #tpu.memory_space<vmem>>, vector<16x1xf32>,
    } else {
    }
    %c1_i32_35 = arith.constant 1 : i32
    %82 = arith.cmpi eq, %arg1, %c1_i32_35 : i32
    %83 = arith.extui %82 : i1 to i32
    %c0_i32_36 = arith.constant 0 : i32
    %84 = arith.cmpi ne, %83, %c0_i32_36 : i32
    scf.if %84 {
      %c0_37 = arith.constant 0 : index
      %c0_38 = arith.constant 0 : index
      %85 = vector.load %arg14[%c0_37, %c0_38] : memref<16x1xf32, #tpu.memory_space<vmem>>, vector<16x1xf32>
      %cst_39 = arith.constant 3.906250e-03 : f32
      %86 = vector.broadcast %cst_39 : f32 to vector<16x1xf32>
      %87 = arith.mulf %85, %86 : vector<16x1xf32>
      %c0_40 = arith.constant 0 : index
      %c0_41 = arith.constant 0 : index
      %88 = vector.load %arg6[%c0_40, %c0_41] : memref<16x4xf32, #tpu.memory_space<vmem>>, vector<16x4xf32>
      %89 = vector.broadcast %87 : vector<16x1xf32> to vector<16x4xf32>
      %90 = arith.mulf %88, %89 : vector<16x4xf32>
      %cst_42 = arith.constant dense<0.000000e+00> : vector<4xf32>
      %91 = vector.multi_reduction <add>, %90, %cst_42 [0] : vector<16x4xf32> to vector<4xf32>
      %92 = vector.shape_cast %91 : vector<4xf32> to vector<1x4xf32>
      %c0_43 = arith.constant 0 : index
      %c0_44 = arith.constant 0 : index
      %93 = vector.load %arg7[%c0_43, %c0_44] : memref<1x4xf32, #tpu.memory_space<vmem>>, vector<1x4xf32>
      %94 = arith.addf %92, %93 : vector<1x4xf32>
      %cst_45 = arith.constant 0.000000e+00 : f32
      %95 = vector.broadcast %cst_45 : f32 to vector<1x4xf32>
      %96 = arith.maximumf %94, %95 : vector<1x4xf32>
      %c0_46 = arith.constant 0 : index
      %c0_47 = arith.constant 0 : index
      %97 = vector.load %arg8[%c0_46, %c0_47] : memref<16x4xf32, #tpu.memory_space<vmem>>, vector<16x4xf32>
      %98 = vector.broadcast %96 : vector<1x4xf32> to vector<16x4xf32>
      %99 = arith.mulf %97, %98 : vector<16x4xf32>
      %cst_48 = arith.constant dense<0.000000e+00> : vector<16xf32>
      %100 = vector.multi_reduction <add>, %99, %cst_48 [1] : vector<16x4xf32> to vector<16xf32>
      %101 = vector.shape_cast %100 : vector<16xf32> to vector<16x1xf32>
      %c0_49 = arith.constant 0 : index
      %c0_50 = arith.constant 0 : index
      %102 = vector.load %arg9[%c0_49, %c0_50] : memref<16x1xf32, #tpu.memory_space<vmem>>, vector<16x1xf32>
      %103 = arith.addf %101, %102 : vector<16x1xf32>
      %cst_51 = arith.constant 0.000000e+00 : f32
      %104 = vector.broadcast %cst_51 : f32 to vector<16x1xf32>
      %105 = arith.subf %104, %103 : vector<16x1xf32>
      %106 = math.exp %105 : vector<16x1xf32>
      %cst_52 = arith.constant 1.000000e+00 : f32
      %107 = vector.broadcast %cst_52 : f32 to vector<16x1xf32>
      %108 = arith.addf %107, %106 : vector<16x1xf32>
      %cst_53 = arith.constant 1.000000e+00 : f32
      %109 = vector.broadcast %cst_53 : f32 to vector<16x1xf32>
      %110 = arith.divf %109, %108 : vector<16x1xf32>
      %111 = vector.broadcast %110 : vector<16x1xf32> to vector<16x128xf32>
      %112 = arith.mulf %73, %111 : vector<16x128xf32>
      %113 = arith.truncf %112 : vector<16x128xf32> to vector<16x128xbf16>
      %c0_54 = arith.constant 0 : index
      %c0_55 = arith.constant 0 : index
      %114 = vector.load %arg10[%c0_54, %c0_55] : memref<4x16xbf16, #tpu.memory_space<vmem>>, vector<4x16xbf16>
      %cst_56 = arith.constant dense<0.000000e+00> : vector<4x128xf32>
      %115 = tpu.matmul %114, %113, %cst_56 {dimension_numbers = #tpu.dot_dimension_numbers<[1], [0], [0], [1], [0, 0, 1, 1], [], []>} : vector<4x16xbf16>, vector<16x128xbf16>, vector<4x128xf32> -> vector<4x128xf32>
      %c0_57 = arith.constant 0 : index
      %c0_58 = arith.constant 0 : index
      %116 = vector.load %arg11[%c0_57, %c0_58] : memref<4x1xf32, #tpu.memory_space<vmem>>, vector<4x1xf32>
      %117 = vector.broadcast %116 : vector<4x1xf32> to vector<4x128xf32>
      %118 = arith.addf %115, %117 : vector<4x128xf32>
      %119 = arith.addf %118, %43 : vector<4x128xf32>
      %cst_59 = arith.constant 0.000000e+00 : f32
      %120 = vector.broadcast %cst_59 : f32 to vector<4x128xf32>
      %121 = arith.maximumf %119, %120 : vector<4x128xf32>
      %c0_60 = arith.constant 0 : index
      %c0_61 = arith.constant 0 : index
      %c0_62 = arith.constant 0 : index
      %122 = vector.load %arg12[%c0_60, %c0_61, %c0_62] : memref<1x4x128xf32, #tpu.memory_space<vmem>>, vector<1x4x128xf32>
      %123 = vector.shape_cast %122 : vector<1x4x128xf32> to vector<4x128xf32>
      %124 = vector.shape_cast %121 : vector<4x128xf32> to vector<1x4x128xf32>
      tpu.vector_store %arg12[%c0_60, %c0_61, %c0_62], %124 {strides = array<i32>} : memref<1x4x128xf32, #tpu.memory_space<vmem>>, vector<1x4x128xf32>,
    } else {
    }
    return
  }
  func.func @transform_0(%arg0: i32, %arg1: i32, %arg2: i32) -> (i32, i32, i32, i32) {
    %c0_i32 = arith.constant 0 : i32
    %c0_i32_0 = arith.constant 0 : i32
    %c0_i32_1 = arith.constant 0 : i32
    return %arg0, %arg2, %c0_i32, %c0_i32_0 : i32, i32, i32, i32
  }
  func.func @transform_1(%arg0: i32, %arg1: i32, %arg2: i32) -> (i32, i32) {
    %c0_i32 = arith.constant 0 : i32
    %c0_i32_0 = arith.constant 0 : i32
    %c0_i32_1 = arith.constant 0 : i32
    return %c0_i32, %c0_i32_0 : i32, i32
  }
  func.func @transform_2(%arg0: i32, %arg1: i32, %arg2: i32) -> (i32, i32) {
    %c0_i32 = arith.constant 0 : i32
    %c0_i32_0 = arith.constant 0 : i32
    %c0_i32_1 = arith.constant 0 : i32
    return %c0_i32, %c0_i32_0 : i32, i32
  }
  func.func @transform_3(%arg0: i32, %arg1: i32, %arg2: i32) -> (i32, i32) {
    %c0_i32 = arith.constant 0 : i32
    %c0_i32_0 = arith.constant 0 : i32
    %c0_i32_1 = arith.constant 0 : i32
    return %c0_i32, %c0_i32_0 : i32, i32
  }
  func.func @transform_4(%arg0: i32, %arg1: i32, %arg2: i32) -> (i32, i32) {
    %c0_i32 = arith.constant 0 : i32
    %c0_i32_0 = arith.constant 0 : i32
    %c0_i32_1 = arith.constant 0 : i32
    return %c0_i32, %c0_i32_0 : i32, i32
  }
  func.func @transform_5(%arg0: i32, %arg1: i32, %arg2: i32) -> (i32, i32) {
    %c0_i32 = arith.constant 0 : i32
    %c0_i32_0 = arith.constant 0 : i32
    %c0_i32_1 = arith.constant 0 : i32
    return %c0_i32, %c0_i32_0 : i32, i32
  }
  func.func @transform_6(%arg0: i32, %arg1: i32, %arg2: i32) -> (i32, i32) {
    %c0_i32 = arith.constant 0 : i32
    %c0_i32_0 = arith.constant 0 : i32
    %c0_i32_1 = arith.constant 0 : i32
    return %c0_i32, %c0_i32_0 : i32, i32
  }
  func.func @transform_7(%arg0: i32, %arg1: i32, %arg2: i32) -> (i32, i32) {
    %c0_i32 = arith.constant 0 : i32
    %c0_i32_0 = arith.constant 0 : i32
    %c0_i32_1 = arith.constant 0 : i32
    return %c0_i32, %c0_i32_0 : i32, i32
  }
  func.func @transform_8(%arg0: i32, %arg1: i32, %arg2: i32) -> (i32, i32) {
    %c0_i32 = arith.constant 0 : i32
    %c0_i32_0 = arith.constant 0 : i32
    %c0_i32_1 = arith.constant 0 : i32
    return %c0_i32, %c0_i32_0 : i32, i32
  }
  func.func @transform_9(%arg0: i32, %arg1: i32, %arg2: i32) -> (i32, i32, i32) {
    %0 = arith.muli %arg1, %arg2 : i32
    %c0_i32 = arith.constant 0 : i32
    %c0_i32_0 = arith.constant 0 : i32
    return %arg0, %c0_i32, %0 : i32, i32, i32
  }
}

</mosaic_0001>

<bundles_post_ra>
// kernel: fused_mbconv.1
= control target key start
LH: loop header
LB: loop body
LE: loop exit
PB: predicated region body
PF: predicated region fallthrough
CT: control target
= control target key end

     0   :  { %s1060_s30 = smov 0   ;;  %s1062_s10 = smov 0   ;;  %s1228_s0 = inlined_call_operand.vmem [shape: f32[2,2,4,256], index: 0, kind: input, shape index: {}]   ;;  %s1229_s1 = inlined_call_operand.vmem [shape: bf16[16,36], index: 1, kind: input, shape index: {}]   ;;  %s1230_s2 = inlined_call_operand.vmem [shape: f32[16,1], index: 2, kind: input, shape index: {}]   ;;  %s1231_s3 = inlined_call_operand.vmem [shape: f32[16,4], index: 3, kind: input, shape index: {}]   ;;  %s1232_s4 = inlined_call_operand.vmem [shape: f32[1,4], index: 4, kind: input, shape index: {}]   ;;  %s1233_s5 = inlined_call_operand.vmem [shape: f32[16,4], index: 5, kind: input, shape index: {}]   ;;  %s1234_s6 = inlined_call_operand.vmem [shape: f32[16,1], index: 6, kind: input, shape index: {}]   ;;  %s1235_s7 = inlined_call_operand.vmem [shape: bf16[4,16], index: 7, kind: input, shape index: {}]   ;;  %s1236_s8 = inlined_call_operand.vmem [shape: f32[4,1], index: 8, kind: input, shape index: {}]   ;;  %s1237_s9 = inlined_call_operand.vmem [shape: f32[2,4,256], index: 9, kind: output, shape index: {}]  }
   0x1   :  { %s1064_s11 = smov 0   ;;  %s1066_s12 = smov 0  }
   0x2   :  { %s1068_s13 = smov 0   ;;  %s1070_s14 = smov 0  }
   0x3   :  { %s1072_s15 = smov 0  }
   0x4 LB: > { %1240 = sst [smem:[#allocation4_spill]] %s984_s13  ;;  %s31_s16 = sadd.s32 1, %s980_s12  ;;  %s992_s15 = sphi %s1072_s15, %s19_s15   ;;  %s988_s14 = sphi %s1070_s14, %s1253_s14   ;;  %s984_s13 = sphi %s1068_s13, %s1252_s13   ;;  %s980_s12 = sphi %s1066_s12, %s1255_s12   ;;  %s976_s11 = sphi %s1064_s11, %s1250_s11   ;;  %s972_s10 = sphi %s1062_s10, %s1249_s10   ;;  %s968_s30 = sphi %s1060_s30, %s1254_s30  }
   0x5   : > { %1241 = sst [smem:[#allocation5_spill]] %s988_s14  ;;  %p32_p0 = scmp.ge.s32.totalorder %s31_s16, 2 }
   0x6   : > { %s34_s17 = sadd.s32 1, %s984_s13  ;;  %p817_p1 = scmp.ge.s32.totalorder %s992_s15, 1 }
   0x7   : > { %p316_p2 = scmp.lt.s32.totalorder %s992_s15, 9  ;;  %s1257_s16 = smov (%p32_p0, %s31_s16), 0 }
   0x8   : > { %1242 = sst [smem:[#allocation6_spill]] %s1257_s16  ;;  %s1259_s17 = smov (!%p32_p0, %s34_s17), %s984_s13 }
   0x9   : > { %p317_p3 = pnand %p817_p1, %p316_p2  ;;  %p36_p4 = scmp.ge.s32.totalorder %s1259_s17, 2 }
   0xa   : > { %s38_s18 = sadd.s32 1, %s988_s14  ;;  %p360_p6 = scmp.lt.s32.totalorder (!%p317_p3), %s976_s11, 1  ;;  %v997_v2 = vmov (!%p317_p3), 0.0   ;;  %vm1004_vm0 = vmmov (!%p317_p3), 0   ;;  %v491_v3 = vld [vmem:[%s1230_s2] sm:$0xff] (!%p317_p3)  ;;  %v492_v4 = vld [vmem:[%s1230_s2 + $0x8] sm:$0xff] (!%p317_p3)  ;;  %v381_v6 = vlaneseq (!%p317_p3) }
   0xb   : > { %s1261_s17 = smov (%p36_p4, %s1259_s17), 0  ;;  %s1263_s18 = smov (!%p36_p4, %s38_s18), %s988_s14 }
   0xc   : > { %1243 = sst [smem:[#allocation7_spill]] %s1261_s17  ;;  %p40_p5 = scmp.ge.s32.totalorder %s1263_s18, 2  ;;  %836 = vmatprep.subr.bf16.mxu0 (!%p317_p3), %v997_v2  ;;  %842 = vmatprep.mubr.msk.bf16.mxu0 (!%p317_p3), %vm1004_vm0, %v997_v2  ;;  %v1005_v5 = vmov (!%p317_p3), 0   ;;  %v382_v7 = vand.u32 (!%p317_p3), 127, %v381_v6  ;;  %vm414_vm1 = vcmask (!%p317_p3), 793600   ;;  %vm423_vm3 = vcmask (!%p317_p3), 662528  }
   0xd   : > { %320 = sbr.rel (%p317_p3) target bundleno = 1251 (0x4e3), region = 56  ;;  %p362_p7 = scmp.lt.s32.totalorder (!%p317_p3), %s968_s30, 1  ;;  %924 = vset.pattern.permute.xlu0 (!%p317_p3), %v1005_v5  ;;  %925 = vset.pattern.permute.xlu1 (!%p317_p3), %v1005_v5  ;;  %vm405_vm4 = vcmask (!%p317_p3), 924672   ;;  %vm432_vm5 = vcmask (!%p317_p3), 916480   ;;  %vm458_vm6 = vcmask (!%p317_p3), 908288   ;;  %vm467_vm8 = vcmask (!%p317_p3), 777216  }
   0xe   : > { %s1265_s18 = smov (%p40_p5, %s1263_s18), 0  ;;  %s369_s19 = smul.u32 (!%p317_p3), %s968_s30, %s972_s10  ;;  %v387_v8 = vand.u32 (!%p317_p3), 15, %v382_v7  ;;  %vm440_vm9 = vcmask (!%p317_p3), 785408   ;;  %vm448_vm10 = vcmask (!%p317_p3), 654336   ;;  %vm476_vm11 = vcmask (!%p317_p3), 646144   ;;  %v927_v53 = vld [vmem:[%s1229_s1] sm:$0xff] (!%p317_p3)  }
   0xf   : > { %1244 = sst [smem:[#allocation8_spill]] %s1265_s18  ;;  %s994_s29 = smov (!%p317_p3), 97   ;;  %vm512_vm12 = vcmask (!%p317_p3), 1041408   ;;  %vm508_vm13 = vcmask (!%p317_p3), 293888  }
  0x10   : > { %p372_p8 = scmp.lt.s32.totalorder (!%p317_p3), %s369_s19, 1  ;;  %s995_s18 = smov (!%p317_p3), 113   ;;  %vm1127_vm2 = vcmp.ne.s32.totalorder (!%p317_p3), %v387_v8, 0  ;;  %vm1137_vm7 = vcmp.ne.s32.totalorder (!%p317_p3), %v387_v8, 15 }
  0x11   : > { %s1001_s13 = smov (!%p317_p3), 96   ;;  %s1002_s14 = smov (!%p317_p3), 80  }
  0x12   : > { %p559_p9 = scmp.eq.s32.totalorder (!%p317_p3), %s972_s10, 0  ;;  %p560_p10 = scmp.eq.s32.totalorder (!%p317_p3), %s968_s30, 0 }
  0x14   : > { %s1267_s11 = smov (!%p360_p6, %s976_s11), 1  ;;  %s1269_s19 = smov (!%p372_p8, %s369_s19), 1 }
  0x15   : > { %s363_s20 = scalar_select %p362_p7, %s968_s30, 1 }
  0x16   : > { %s819_s21 = sshll.u32 %s1267_s11, 2  ;;  %s821_s28 = sshll.u32 %s1267_s11, 1 }
  0x17   : > { %s818_s22 = sshll.u32 %s363_s20, 1  ;;  %s375_s17 = sadd.s32 %s821_s28, %s1269_s19 }
  0x18   : > { %s366_s23 = sadd.s32 %s819_s21, %s818_s22  ;;  %s822_s16 = sshll.u32 %s375_s17, 2 }
  0x19   : > { %s820_s24 = sshll.u32 %s366_s23, 2  ;;  %s1116_s20 = scalar_lea.vmem %s1237_s9, %s822_s16 }
  0x1a   : > { %s368_s27 = scalar_lea.vmem %s1228_s0, %s820_s24  ;;  %s996_s21 = smov 81  }
  0x1b   : > { %v380_v0 = vld [vmem:[%s368_s27] sm:$0xff]  ;;  %s998_s11 = smov 112   ;;  %s999_s22 = smov 111  }
  0x1c   : > { %410 = vrot.lane.b32.xlu1 %v380_v0, %s994_s29  ;;  %401 = vrot.lane.b32.xlu0 %v380_v0, %s995_s18  ;;  %v400_v1 = vcombine.high %v380_v0, %v380_v0  ;;  %s1000_s17 = smov 95   ;;  %s1003_s16 = smov 79  }
  0x1d   : > { %p561_p11 = pnand %p560_p10, %p559_p9 }
  0x1e   : > { %vm565_vm14 = vcmask (!%p561_p11), 7168  }
  0x20   : > { %419 = vrot.lane.b32.xlu0 %v380_v0, %s996_s21  ;;  %412 = vrot.lane.b32.xlu1 %v400_v1, %s994_s29 }
  0x24   : > { %421 = vrot.lane.b32.xlu1 %v400_v1, %s996_s21  ;;  %403 = vrot.lane.b32.xlu0 %v400_v1, %s995_s18 }
  0x28   : > { %430 = vrot.lane.b32.xlu1 %v400_v1, %s998_s11  ;;  %428 = vrot.lane.b32.xlu0 %v380_v0, %s998_s11 }
  0x2c   : > { %456 = vrot.lane.b32.xlu1 %v400_v1, %s999_s22  ;;  %454 = vrot.lane.b32.xlu0 %v380_v0, %s999_s22 }
  0x30   : > { %465 = vrot.lane.b32.xlu1 %v400_v1, %s1000_s17  ;;  %463 = vrot.lane.b32.xlu0 %v380_v0, %s1000_s17 }
  0x34   : > { %438 = vrot.lane.b32.xlu1 %v400_v1, %s1001_s13  ;;  %436 = vrot.lane.b32.xlu0 %v380_v0, %s1001_s13 }
  0x38   : > { %446 = vrot.lane.b32.xlu1 %v400_v1, %s1002_s14  ;;  %444 = vrot.lane.b32.xlu0 %v380_v0, %s1002_s14 }
  0x3c   : > { %474 = vrot.lane.b32.xlu1 %v400_v1, %s1003_s16  ;;  %472 = vrot.lane.b32.xlu0 %v380_v0, %s1003_s16  ;;  %v1006_v0 = vmov (!%p561_p11), 0.0  }
  0x3d   : > { %566 = vst.msk [vmem:[#allocation3] sm:$0xff] (!%p561_p11), %vm565_vm14, %v1006_v0  ;;  %567 = vst.msk [vmem:[#allocation3 + $0x8] sm:$0xff] (!%p561_p11), %vm565_vm14, %v1006_v0 }
  0x40   : > { %495 = vperm.xlu0 %924, %v491_v3   ;;  %500 = vperm.xlu1 %925, %v492_v4  }
  0x8e   : > { %v411_v9 = vpop.permute.xlu1 %410  ;;  %v402_v10 = vpop.permute.xlu0 %401 }
  0x92   : > { %v420_v12 = vpop.permute.xlu0 %419  ;;  %v413_v13 = vpop.permute.xlu1 %412 }
  0x93   : > { %v415_v14 = vsel %vm414_vm1, %v411_v9, %v413_v13 }
  0x94   : > { %v417_v15 = vsel %vm1127_vm2, %v415_v14, 0.0 }
  0x95   : > { %418 = vst [vmem:[#allocation2 + $0x4] sm:$0xf] %v417_v15 }
  0x96   : > { %v422_v16 = vpop.permute.xlu1 %421  ;;  %v404_v17 = vpop.permute.xlu0 %403 }
  0x97   : > { %v424_v18 = vsel %vm423_vm3, %v420_v12, %v422_v16  ;;  %v406_v19 = vsel %vm405_vm4, %v402_v10, %v404_v17 }
  0x98   : > { %v426_v20 = vsel %vm1127_vm2, %v424_v18, 0.0  ;;  %v408_v21 = vsel %vm1127_vm2, %v406_v19, 0.0 }
  0x99   : > { %427 = vst [vmem:[#allocation2 + $0x8] sm:$0xf] %v426_v20  ;;  %409 = vst [vmem:[#allocation2] sm:$0xf] %v408_v21 }
  0x9a   : > { %v431_v22 = vpop.permute.xlu1 %430  ;;  %v429_v23 = vpop.permute.xlu0 %428 }
  0x9b   : > { %v433_v24 = vsel %vm432_vm5, %v429_v23, %v431_v22 }
  0x9c   : > { %435 = vst [vmem:[#allocation2 + $0xc] sm:$0xf] %v433_v24 }
  0x9e   : > { %v457_v26 = vpop.permute.xlu1 %456  ;;  %v455_v27 = vpop.permute.xlu0 %454 }
  0x9f   : > { %v459_v28 = vsel %vm458_vm6, %v455_v27, %v457_v26 }
  0xa0   : > { %v461_v29 = vsel %vm1137_vm7, %v459_v28, 0.0  ;;  %v481_v33 = vld [vmem:[#allocation2] sm:$0xff] }
  0xa1   : > { %462 = vst [vmem:[#allocation2 + $0x18] sm:$0xf] %v461_v29 }
  0xa2   : > { %v466_v30 = vpop.permute.xlu1 %465  ;;  %v464_v31 = vpop.permute.xlu0 %463 }
  0xa3   : > { %v468_v32 = vsel %vm467_vm8, %v464_v31, %v466_v30  ;;  %v482_v34 = vld [vmem:[#allocation2 + $0x8] sm:$0xff] }
  0xa4   : > { %v470_v35 = vsel %vm1137_vm7, %v468_v32, 0.0  ;;  %v486_v36 = vpack.c.bf16 %v482_v34, %v481_v33 }
  0xa5   : > { %471 = vst [vmem:[#allocation2 + $0x1c] sm:$0xf] %v470_v35 }
  0xa6   : > { %v439_v37 = vpop.permute.xlu1 %438  ;;  %837 = vmatpush3.bf16.msra.mxu0 %v486_v36  ;;  %v437_v38 = vpop.permute.xlu0 %436 }
  0xa7   : > { %v1145_v39 = vsel %vm440_vm9, %v437_v38, %v439_v37  ;;  %838 = vmatprep.subr.bf16.mxu0 %v997_v2 }
  0xa8   : > { %443 = vst [vmem:[#allocation2 + $0x10] sm:$0xf] %v1145_v39 }
  0xaa   : > { %v447_v40 = vpop.permute.xlu1 %446  ;;  %v445_v41 = vpop.permute.xlu0 %444 }
  0xab   : > { %v449_v42 = vsel %vm448_vm10, %v445_v41, %v447_v40 }
  0xac   : > { %451 = vst [vmem:[#allocation2 + $0x14] sm:$0xf] %v449_v42  ;;  %v484_v48 = vld [vmem:[#allocation2 + $0x18] sm:$0xff] }
  0xae   : > { %v475_v43 = vpop.permute.xlu1 %474  ;;  %v473_v44 = vpop.permute.xlu0 %472 }
  0xaf   : > { %v477_v45 = vsel %vm476_vm11, %v473_v44, %v475_v43 }
  0xb0   : > { %v479_v46 = vsel %vm1137_vm7, %v477_v45, 0.0 }
  0xb1   : > { %480 = vst [vmem:[#allocation2 + $0x20] sm:$0xf] %v479_v46 }
  0xb3   : > { %v483_v47 = vld [vmem:[#allocation2 + $0x10] sm:$0xff] }
  0xb4   : > { %v487_v49 = vpack.c.bf16 %v484_v48, %v483_v47 }
  0xb6   : > { %839 = vmatpush3.bf16.msra.mxu0 %v487_v49 }
  0xb7   : > { %840 = vmatprep.subr.bf16.mxu0 %v997_v2 }
  0xb8   : > { %v485_v50 = vld [vmem:[#allocation2 + $0x20] sm:$0xf] }
  0xb9   : > { %v488_v51 = vpack.c.bf16 %v485_v50, %v485_v50 }
  0xbb   : > { %v514_v52 = vsel %vm512_vm12, %v488_v51, 0 }
  0xbc   : > { %841 = vmatpush3.bf16.msra.mxu0 %v514_v52 }
  0xbf   : > { %843 = vmatmul.mubr.msk.bf16.vlgmr.msra.gmra.mrb[0].mxu0 %vm508_vm13, %v927_v53  ;;  %v496_v54 = vpop.permute.xlu0 %495  ;;  %v501_v56 = vpop.permute.xlu1 %500 }
 0x191   : > { %564 = sbr.rel (%p561_p11) target bundleno = 408 (0x198), region = 60 }
 0x192   : > { %v550_v55 = vpop.f32.mrb[0].mxu0 }
 0x193   : > { %v1157_v57 = vadd.f32 %v550_v55, %v496_v54  ;;  %v844_v58 = vpop.f32.mrb[1].mxu0 }
 0x194   : > { %v553_v59 = vpop.f32.mrb[2].mxu0 }
 0x195   : > { %v557_v60 = vmax.f32 %v1157_v57, 0.0  ;;  %v1160_v61 = vadd.f32 %v553_v59, %v501_v56  ;;  %v845_v62 = vpop.f32.mrb[3].mxu0 }
 0x197   : > { %v558_v63 = vmax.f32 %v1160_v61, 0.0 }
 0x198 PF: > { %p825_p12 = scmp.ne.s32.totalorder %s972_s10, 0 }
 0x199   : > { %573 = vadd.xlane.f32.xlu0 (!%p825_p12), %v557_v60  ;;  %v571_v1 = vld [vmem:[#allocation3] sm:$0xff] (!%p825_p12)  ;;  %vm579_vm15 = vcmask (!%p825_p12), 7168   ;;  %v572_v4 = vld [vmem:[#allocation3 + $0x8] sm:$0xff] (!%p825_p12) }
 0x19a   : > { %570 = sbr.rel (%p825_p12) target bundleno = 558 (0x22e), region = 64 }
 0x19d   : > { %575 = vadd.xlane.f32.xlu0 (!%p825_p12), %v558_v63 }
 0x226   : > { %v574_v2 = vpop.xlane.xlu0 %573 }
 0x227   : > { %v577_v3 = vadd.f32 %v574_v2, %v571_v1 }
 0x229   : > { %580 = vst.msk [vmem:[#allocation3] sm:$0xff] %vm579_vm15, %v577_v3 }
 0x22a   : > { %v576_v5 = vpop.xlane.xlu0 %575 }
 0x22b   : > { %v578_v7 = vadd.f32 %v576_v5, %v572_v4 }
 0x22d   : > { %581 = vst.msk [vmem:[#allocation3 + $0x8] sm:$0xff] %vm579_vm15, %v578_v7 }
 0x22e PF: > { %p826_p13 = scmp.ne.s32.totalorder %s972_s10, 1 }
 0x22f   : > { %v1007_v10 = vmov (!%p826_p13), 0   ;;  %v590_v13 = vld [vmem:[%s1231_s3] sm:$0xff] (!%p826_p13)  ;;  %v591_v15 = vld [vmem:[%s1231_s3 + $0x8] sm:$0xff] (!%p826_p13)  ;;  %vm604_vm0 = vcmask (!%p826_p13), 31744   ;;  %v620_v27 = vshrl.u32 (!%p826_p13), %v381_v6, 7  ;;  %v1008_v58 = vmov (!%p826_p13), 0.0  }
 0x230   : > { %585 = sbr.rel (%p826_p13) target bundleno = 1251 (0x4e3), region = 68  ;;  %v586_v8 = vld [vmem:[#allocation3] sm:$0xff] (!%p826_p13)  ;;  %928 = vset.pattern.permute.xlu0 (!%p826_p13), %v1007_v10  ;;  %929 = vset.pattern.permute.xlu1 (!%p826_p13), %v1007_v10  ;;  %v614_v28 = vld [vmem:[%s1232_s4] sm:$0x1] (!%p826_p13)  ;;  %vm1009_vm1 = vmmov (!%p826_p13), 0   ;;  %vm667_vm2 = vcmask (!%p826_p13), 130048  }
 0x231   : > { %v588_v11 = vmul.f32 (!%p826_p13), 0.00390625, %v586_v8  ;;  %v621_v31 = vsub.s32 (!%p826_p13), 0, %v620_v27  ;;  %v617_v33 = vld [vmem:[%s1233_s5] sm:$0xff] (!%p826_p13)  ;;  %v618_v35 = vld [vmem:[%s1233_s5 + $0x8] sm:$0xff] (!%p826_p13)  ;;  %846 = vmatprep.subr.bf16.mxu0 (!%p826_p13), %v1008_v58  ;;  %848 = vmatprep.mubr.msk.bf16.mxu0 (!%p826_p13), %vm1009_vm1, %v1008_v58 }
 0x232   : > { %v631_v40 = vld [vmem:[%s1234_s6] sm:$0xff] (!%p826_p13)  ;;  %v632_v43 = vld [vmem:[%s1234_s6 + $0x8] sm:$0xff] (!%p826_p13) }
 0x233   : > { %594 = vperm.xlu0 (!%p826_p13), %928, %v588_v11   ;;  %v661_v55 = vld [vmem:[%s1236_s8] sm:$0xf] (!%p826_p13) }
 0x234   : > { %v587_v9 = vld [vmem:[#allocation3 + $0x8] sm:$0xff] (!%p826_p13)  ;;  %v660_v3 = vld [vmem:[%s1235_s7] sm:$0x3] (!%p826_p13) }
 0x235   : > { %v589_v12 = vmul.f32 (!%p826_p13), 0.00390625, %v587_v9 }
 0x237   : > { %599 = vperm.xlu0 %928, %v589_v12  }
 0x2b2   : > { %v595_v14 = vpop.permute.xlu0 %594 }
 0x2b3   : > { %v602_v16 = vmul.f32 %v595_v14, %v590_v13 }
 0x2b5   : > { %v605_v19 = vsel %vm604_vm0, %v602_v16, 0.0 }
 0x2b6   : > { %v600_v17 = vpop.permute.xlu0 %599 }
 0x2b7   : > { %v603_v18 = vmul.f32 %v600_v17, %v591_v15 }
 0x2b9   : > { %v606_v20 = vsel %vm604_vm0, %v603_v18, 0.0 }
 0x2ba   : > { %v607_v21 = vadd.f32 %v606_v20, %v605_v19 }
 0x2bc   : > { %v608_v22 = vrot.slane %v607_v21, 4 }
 0x2be   : > { %v609_v23 = vadd.f32 %v608_v22, %v607_v21 }
 0x2c0   : > { %v610_v24 = vrot.slane %v609_v23, 2 }
 0x2c2   : > { %v611_v25 = vadd.f32 %v610_v24, %v609_v23 }
 0x2c4   : > { %v612_v26 = vrot.slane %v611_v25, 1 }
 0x2c6   : > { %v613_v29 = vadd.f32 %v612_v26, %v611_v25 }
 0x2c8   : > { %v615_v30 = vadd.f32 %v614_v28, %v613_v29 }
 0x2ca   : > { %v616_v32 = vmax.f32 %v615_v30, 0.0 }
 0x2cc   : > { %v622_v34 = vrot.slane %v616_v32, %v621_v31 }
 0x2ce   : > { %v623_v36 = vmul.f32 %v622_v34, %v617_v33  ;;  %v624_v37 = vmul.f32 %v622_v34, %v618_v35 }
 0x2d0   : > { %v625_v6 = vsel %vm604_vm0, %v623_v36, 0.0  ;;  %v628_v38 = vsel %vm604_vm0, %v624_v37, 0.0 }
 0x2d1   : > { %626 = vadd.xlane.f32.xlu1 %v625_v6 }
 0x2d5   : > { %629 = vadd.xlane.f32.xlu1 %v628_v38 }
 0x35e   : > { %v627_v41 = vpop.xlane.xlu1 %626 }
 0x35f   : > { %v633_v42 = vadd.f32 %v631_v40, %v627_v41 }
 0x361   : > { %v635_v44 = vsub.f32 0.0, %v633_v42 }
 0x362   : > { %v630_v45 = vpop.xlane.xlu1 %629 }
 0x363   : > { %v637_v46 = vmul.f32 1.442695, %v635_v44  ;;  %v634_v47 = vadd.f32 %v632_v43, %v630_v45 }
 0x365   : > { %930 = vpow2.f32 %v637_v46  ;;  %v636_v48 = vsub.f32 0.0, %v634_v47 }
 0x367   : > { %v639_v49 = vmul.f32 1.442695, %v636_v48 }
 0x369   : > { %932 = vpow2.f32 %v639_v49 }
 0x36f   : > { %v931_v50 = vpop.eup %930 }
 0x370   : > { %v641_v51 = vadd.f32 1.0, %v931_v50 }
 0x372   : > { %934 = vrcp.f32 %v641_v51 }
 0x373   : > { %v933_v52 = vpop.eup %932 }
 0x374   : > { %v642_v53 = vadd.f32 1.0, %v933_v52 }
 0x376   : > { %936 = vrcp.f32 %v642_v53 }
 0x37c   : > { %v935_v54 = vpop.eup %934 }
 0x37d   : > { %649 = vperm.xlu0 %928, %v935_v54  }
 0x380   : > { %v937_v56 = vpop.eup %936 }
 0x381   : > { %664 = vperm.xlu0 %928, %v661_v55   ;;  %654 = vperm.xlu1 %929, %v937_v56  }
 0x3fc   : > { %v650_v59 = vpop.permute.xlu0 %649 }
 0x3fd   : > { %v657_v0 = vmul.f32 %v650_v59, %v557_v60 }
 0x400   : > { %v655_v62 = vpop.permute.xlu1 %654  ;;  %v665_v4 = vpop.permute.xlu0 %664 }
 0x401   : > { %v658_v1 = vmul.f32 %v655_v62, %v558_v63 }
 0x403   : > { %v659_v2 = vpack.c.bf16 %v658_v1, %v657_v0 }
 0x405   : > { %847 = vmatpush3.bf16.msra.mxu0 %v659_v2 }
 0x408   : > { %849 = vmatmul.mubr.msk.bf16.vlgmr.msra.gmra.mrb[0].mxu0 %vm667_vm2, %v660_v3 }
 0x4db   : > { %v705_v5 = vpop.f32.mrb[0].mxu0 }
 0x4dc   : > { %v706_v7 = vadd.f32 %v705_v5, %v665_v4  ;;  %v850_v8 = vpop.f32.mrb[1].mxu0 }
 0x4dd   : > { %v708_v9 = vpop.f32.mrb[2].mxu0 }
 0x4de   : > { %v711_v57 = vadd.f32 %v706_v7, %v1145_v39  ;;  %v851_v10 = vpop.f32.mrb[3].mxu0 }
 0x4e0   : > { %v712_v60 = vmax.f32 %v711_v57, 0.0 }
 0x4e2   : > { %713 = vst [vmem:[%s1116_s20] sm:$0xf] %v712_v60 }
 0x4e3 PF: > { %s19_s15 = sadd.s32 1, %s992_s15   ;;  %s1249_s10 = sld [smem:[#allocation4_spill]] }
 0x4e4   : > { %p16_p0 = scmp.ge.s32.totalorder %s19_s15, 10   ;;  %s1250_s11 = sld [smem:[#allocation5_spill]] }
 0x4e5   : > { %s1251_s27 = sld [smem:[#allocation6_spill]]  ;;  %s1252_s13 = sld [smem:[#allocation7_spill]] }
 0x4e6   : > { %s1253_s14 = sld [smem:[#allocation8_spill]]  ;;  %s1254_s30 = smov %s980_s12 }
 0x4e7   :  { %18 = sbr.rel (!%p16_p0) target bundleno = 4 (0x4), region = 98 }
 0x4eb   : > { %s1255_s12 = smov %s1251_s27 }

</bundles_post_ra>
